<compile_context>
chip_gen: v6e
topology: v6e:2x2x1
jax: 0.10.0
libtpu: 0.0.40
codegen_flags: <defaults>
</compile_context>

<pallas_src>
from math import floor, ceil

import numpy as np
import jax
import jax.numpy as jnp
from jax.experimental import pallas as pl
from jax.experimental.pallas import tpu as pltpu


def _level_params(H, W, num_level):
    """Static per-level pooling geometry, mirroring the PyTorch module."""
    params = []
    for i in range(num_level):
        level = i + 1
        k_h, k_w = ceil(H / level), ceil(W / level)
        s_h, s_w = k_h, k_w
        p_h = floor((k_h * level - H + 1) / 2)
        p_w = floor((k_w * level - W + 1) / 2)
        # PyTorch pooling requires padding <= kernel_size / 2; mirror that check.
        if p_h > k_h // 2 or p_w > k_w // 2:
            raise ValueError(
                f"SPP level {level} yields padding {(p_h, p_w)} > half of kernel "
                f"{(k_h, k_w)}; PyTorch F.max_pool2d/avg_pool2d would reject this "
                f"configuration (H={H}, W={W})."
            )
        out_h = (H + 2 * p_h - k_h) // s_h + 1
        out_w = (W + 2 * p_w - k_w) // s_w + 1
        params.append((k_h, k_w, s_h, s_w, p_h, p_w, out_h, out_w))
    return params


def _vmem_capacity_bytes():
    """Physical VMEM per core; conservative 64 MiB fallback (v7x-sized)."""
    cap = 64 * 1024 * 1024
    try:
        info = pltpu.get_tpu_info()
        cap = int(getattr(info, "vmem_capacity_bytes", cap) or cap)
    except Exception:
        pass
    return cap


def _choose_tile_c(C, H, W, itemsize, budget_bytes):
    """Channel tile: full C unless C is a multiple of 128 and the block is large."""
    if C % 128 != 0 or C <= 128:
        return C  # last-dim block must be full C or a multiple of 128
    best = 128
    for t in range(128, C + 1, 128):
        if C % t == 0 and H * W * t * itemsize <= budget_bytes:
            best = max(best, t)
    return best


def _build_avg_pool_matrix(params, H, W, total_bins, dtype):
    """Trace-time (total_bins, W*H) matrix: row b holds 1/(kh*kw) over window b.

    Padded positions carry no weight while the divisor is the FULL kernel size,
    i.e. PyTorch avg_pool2d with count_include_pad=True (its default).
    The flattening order is w-major then h, matching x block reshape (W, H, C) ->
    (W*H, C).
    """
    P = np.zeros((total_bins, W, H), dtype=np.float32)
    b = 0
    for (k_h, k_w, s_h, s_w, p_h, p_w, out_h, out_w) in params:
        inv = 1.0 / float(k_h * k_w)
        for oh in range(out_h):
            h0 = oh * s_h - p_h
            hs, he = max(h0, 0), min(h0 + k_h, H)
            for ow in range(out_w):
                w0 = ow * s_w - p_w
                ws, we = max(w0, 0), min(w0 + k_w, W)
                P[b, ws:we, hs:he] = inv
                b += 1
    return jnp.asarray(P.reshape(total_bins, W * H), dtype=dtype)


def spatial_pyramid_pooling_2d(x, num_level, pool_type="max_pool"):
    """Pallas implementation of SpatialPyramidPooling2d.forward.

    x: (N, C, H, W).  Returns (N, C * sum(l*l for l in 1..num_level)), flattened
    per level in (C, out_h, out_w) order, levels concatenated — identical layout
    to the PyTorch module.
    """
    N, C, H, W = x.shape
    params = _level_params(H, W, num_level)
    total_bins = sum(oh * ow for (*_, oh, ow) in params)

    itemsize = jnp.dtype(x.dtype).itemsize
    phys_vmem = _vmem_capacity_bytes()
    cap = int(phys_vmem * 0.85)

    # Larger channel-tile budget on 128 MiB VMEM parts (v5e/v6e), smaller on v7x.
    tile_budget = 12 * 1024 * 1024 if phys_vmem >= 100 * 1024 * 1024 else 6 * 1024 * 1024
    tile_c = _choose_tile_c(C, H, W, itemsize, tile_budget)
    n_ctiles = C // tile_c

    # v7x has 2 TensorCores: make sure a (1,1) grid is split so both get work.
    if N == 1 and n_ctiles == 1 and C % 256 == 0:
        tile_c = C // 2
        n_ctiles = 2

    # VMEM estimate: double-buffered input + output blocks, plus in-kernel
    # temporaries (strips / bins for max, relayout copy + f32 result + pooling
    # matrix for avg), plus slack for compiler internal scratch.
    in_block = W * H * tile_c * itemsize
    out_block = total_bins * tile_c * itemsize
    if pool_type == "max_pool":
        scratch = num_level * H * tile_c * itemsize + 2 * total_bins * tile_c * 4
    else:
        scratch = (W * H * tile_c * itemsize            # possible reshape copy
                   + total_bins * tile_c * 4            # f32 matmul result
                   + 2 * total_bins * W * H * 4)        # pooling matrix (dbl-buf)
    needed = 2 * in_block + 2 * out_block + scratch + (2 << 20)

    if needed > cap:
        # TODO(synk): tile H into row bands (extra grid axis + per-level strip
        # accumulation in scratch) for huge H*W*C blocks instead of erroring.
        raise ValueError(
            f"SPP block of {needed / 2**20:.1f} MiB exceeds ~{cap / 2**20:.0f} MiB "
            f"usable VMEM (N={N}, C={C}, H={H}, W={W}, tile_c={tile_c}); "
            f"reduce spatial size or use a channel count that is a multiple of 128."
        )
    vmem_limit = None
    if needed > 32 * 1024 * 1024:
        vmem_limit = int(min(needed + needed // 4, cap))

    # Kernel-side layout (N, W, H, C): C on the 128-lane axis, W on a leading dim
    # so the big per-window column reduce is a pure VPU reduce across vregs.
    x_t = jnp.transpose(x, (0, 3, 2, 1))  # (N, W, H, C)

    def max_kernel(x_ref, o_ref):
        xb = x_ref[0]  # (W, H, tile_c); no upcast — max is exact in any dtype.
        bins = []
        for (k_h, k_w, s_h, s_w, p_h, p_w, out_h, out_w) in params:
            # Step 1: reduce each window's columns over the LEADING (W) axis.
            strips = []
            for ow_i in range(out_w):
                w0 = ow_i * s_w - p_w
                ws, we = max(w0, 0), min(w0 + k_w, W)
                strips.append(jnp.max(xb[ws:we], axis=0))  # (H, tile_c)
            # Step 2: small per-window row reduce (clipping == -inf padding).
            for oh_i in range(out_h):
                h0 = oh_i * s_h - p_h
                hs, he = max(h0, 0), min(h0 + k_h, H)
                for ow_i in range(out_w):
                    bins.append(jnp.max(strips[ow_i][hs:he, :], axis=0, keepdims=True))
        # Single dense (total_bins, tile_c) store — no per-bin masked stores.
        o_ref[0] = jnp.concatenate(bins, axis=0).astype(o_ref.dtype)

    def avg_kernel(x_ref, p_ref, o_ref):
        xb = x_ref[0]                                   # (W, H, tile_c)
        x_flat = xb.reshape(W * H, xb.shape[-1])        # (W*H, tile_c)
        pooled = jnp.dot(p_ref[...], x_flat.astype(p_ref.dtype),
                         preferred_element_type=jnp.float32)
        o_ref[0] = pooled.astype(o_ref.dtype)           # one dense store

    x_spec = pl.BlockSpec((1, W, H, tile_c), lambda n, c: (n, 0, 0, c))
    out_spec = pl.BlockSpec((1, total_bins, tile_c), lambda n, c: (n, 0, c))

    if pool_type == "max_pool":
        kernel_fn = max_kernel
        operands = (x_t,)
        in_specs = [x_spec]
        allow_fusion = [True]
    else:
        if jnp.dtype(x.dtype) in (jnp.dtype(jnp.float32), jnp.dtype(jnp.bfloat16)):
            p_dtype = x.dtype
        else:
            p_dtype = jnp.float32
        pool_mat = _build_avg_pool_matrix(params, H, W, total_bins, p_dtype)
        kernel_fn = avg_kernel
        operands = (x_t, pool_mat)
        in_specs = [x_spec,
                    pl.BlockSpec((total_bins, W * H), lambda n, c: (0, 0))]
        allow_fusion = [True, False]

    out = pl.pallas_call(
        kernel_fn,
        out_shape=jax.ShapeDtypeStruct((N, total_bins, C), x.dtype),
        grid_spec=pltpu.PrefetchScalarGridSpec(
            num_scalar_prefetch=0,
            grid=(N, n_ctiles),
            in_specs=in_specs,
            out_specs=out_spec,
        ),
        compiler_params=pltpu.CompilerParams(
            dimension_semantics=("parallel", "parallel"),
            allow_input_fusion=allow_fusion,
            vmem_limit_bytes=vmem_limit,
        ),
    )(*operands)

    # Tiny glue on the (N, total_bins, C) result to match PyTorch's per-level
    # .view(N, -1) ordering (C-major, then row-major spatial), levels concatenated.
    pieces = []
    off = 0
    for (*_, oh, ow) in params:
        nb = oh * ow
        lvl = out[:, off:off + nb, :]  # (N, nb, C)
        pieces.append(jnp.transpose(lvl, (0, 2, 1)).reshape(N, C * nb))
        off += nb
    return jnp.concatenate(pieces, axis=1)


def _reference_spp(x, num_level, pool_type="max_pool"):
    """Pure-JAX NCHW reference (same math as the PyTorch module) for validation."""
    N, C, H, W = x.shape
    pieces = []
    for (k_h, k_w, s_h, s_w, p_h, p_w, out_h, out_w) in _level_params(H, W, num_level):
        rows = []
        for oh in range(out_h):
            h0 = oh * s_h - p_h
            hs, he = max(h0, 0), min(h0 + k_h, H)
            cols = []
            for ow in range(out_w):
                w0 = ow * s_w - p_w
                ws, we = max(w0, 0), min(w0 + k_w, W)
                win = x[:, :, hs:he, ws:we]
                if pool_type == "max_pool":
                    cols.append(jnp.max(win, axis=(2, 3)))
                else:
                    cols.append(jnp.sum(win, axis=(2, 3)) / float(k_h * k_w))
            rows.append(jnp.stack(cols, axis=-1))
        pooled = jnp.stack(rows, axis=-2)  # (N, C, out_h, out_w)
        pieces.append(pooled.reshape(N, -1))
    return jnp.concatenate(pieces, axis=1)


if __name__ == "__main__":
    num_level = 3
    N, C, H, W = 2, 4, 16, 16

    key = jax.random.PRNGKey(0)
    x = jax.random.normal(key, (N, C, H, W), dtype=jnp.float32)

    expected_feats = C * sum((l + 1) ** 2 for l in range(num_level))

    # max_pool path (module default)
    out = spatial_pyramid_pooling_2d(x, num_level, pool_type="max_pool")
    out = jax.block_until_ready(out)
    ref = _reference_spp(x, num_level, pool_type="max_pool")
    assert out.shape == (N, expected_feats), out.shape
    assert jnp.allclose(out, ref, atol=1e-6), "max_pool mismatch vs reference"

    # avg_pool path (count_include_pad=True semantics, PyTorch default)
    out_a = spatial_pyramid_pooling_2d(x, num_level, pool_type="avg_pool")
    out_a = jax.block_until_ready(out_a)
    ref_a = _reference_spp(x, num_level, pool_type="avg_pool")
    assert out_a.shape == (N, expected_feats), out_a.shape
    assert jnp.allclose(out_a, ref_a, atol=1e-5), "avg_pool mismatch vs reference"

    print("KERNEL_OK")
</pallas_src>

<mosaic_0001>
module attributes {stable_mosaic.version = 11 : i64} {
  func.func @max_kernel(%arg0: i32, %arg1: i32, %arg2: memref<1x16x16x4xf32, #tpu.memory_space<vmem>>, %arg3: memref<1x14x4xf32, #tpu.memory_space<vmem>>) attributes {dimension_semantics = [#tpu.dimension_semantics<parallel>, #tpu.dimension_semantics<parallel>], iteration_bounds = array<i64: 2, 1>, scalar_prefetch = 0 : i64, scratch_operands = 0 : i64, tpu.core_type = #tpu.core_type<tc>, window_params = [{transform_indices = @transform_0, window_bounds = array<i64: 1, 16, 16, 4>}, {transform_indices = @transform_1, window_bounds = array<i64: 1, 14, 4>}]} {
    %c0 = arith.constant 0 : index
    %c0_0 = arith.constant 0 : index
    %c0_1 = arith.constant 0 : index
    %c0_2 = arith.constant 0 : index
    %0 = vector.load %arg2[%c0, %c0_0, %c0_1, %c0_2] : memref<1x16x16x4xf32, #tpu.memory_space<vmem>>, vector<1x16x16x4xf32>
    %1 = vector.shape_cast %0 : vector<1x16x16x4xf32> to vector<16x16x4xf32>
    %cst = arith.constant dense<0xFF800000> : vector<16x4xf32>
    %2 = vector.multi_reduction <maximumf>, %1, %cst [0] : vector<16x16x4xf32> to vector<16x4xf32>
    %cst_3 = arith.constant dense<0xFF800000> : vector<4xf32>
    %3 = vector.multi_reduction <maximumf>, %2, %cst_3 [0] : vector<16x4xf32> to vector<4xf32>
    %4 = vector.shape_cast %3 : vector<4xf32> to vector<1x4xf32>
    %5 = vector.extract_strided_slice %1 {offsets = [0, 0, 0], sizes = [8, 16, 4], strides = [1, 1, 1]} : vector<16x16x4xf32> to vector<8x16x4xf32>
    %cst_4 = arith.constant dense<0xFF800000> : vector<16x4xf32>
    %6 = vector.multi_reduction <maximumf>, %5, %cst_4 [0] : vector<8x16x4xf32> to vector<16x4xf32>
    %7 = vector.extract_strided_slice %1 {offsets = [8, 0, 0], sizes = [8, 16, 4], strides = [1, 1, 1]} : vector<16x16x4xf32> to vector<8x16x4xf32>
    %cst_5 = arith.constant dense<0xFF800000> : vector<16x4xf32>
    %8 = vector.multi_reduction <maximumf>, %7, %cst_5 [0] : vector<8x16x4xf32> to vector<16x4xf32>
    %9 = vector.extract_strided_slice %6 {offsets = [0, 0], sizes = [8, 4], strides = [1, 1]} : vector<16x4xf32> to vector<8x4xf32>
    %cst_6 = arith.constant dense<0xFF800000> : vector<4xf32>
    %10 = vector.multi_reduction <maximumf>, %9, %cst_6 [0] : vector<8x4xf32> to vector<4xf32>
    %11 = vector.shape_cast %10 : vector<4xf32> to vector<1x4xf32>
    %12 = vector.extract_strided_slice %8 {offsets = [0, 0], sizes = [8, 4], strides = [1, 1]} : vector<16x4xf32> to vector<8x4xf32>
    %cst_7 = arith.constant dense<0xFF800000> : vector<4xf32>
    %13 = vector.multi_reduction <maximumf>, %12, %cst_7 [0] : vector<8x4xf32> to vector<4xf32>
    %14 = vector.shape_cast %13 : vector<4xf32> to vector<1x4xf32>
    %15 = vector.extract_strided_slice %6 {offsets = [8, 0], sizes = [8, 4], strides = [1, 1]} : vector<16x4xf32> to vector<8x4xf32>
    %cst_8 = arith.constant dense<0xFF800000> : vector<4xf32>
    %16 = vector.multi_reduction <maximumf>, %15, %cst_8 [0] : vector<8x4xf32> to vector<4xf32>
    %17 = vector.shape_cast %16 : vector<4xf32> to vector<1x4xf32>
    %18 = vector.extract_strided_slice %8 {offsets = [8, 0], sizes = [8, 4], strides = [1, 1]} : vector<16x4xf32> to vector<8x4xf32>
    %cst_9 = arith.constant dense<0xFF800000> : vector<4xf32>
    %19 = vector.multi_reduction <maximumf>, %18, %cst_9 [0] : vector<8x4xf32> to vector<4xf32>
    %20 = vector.shape_cast %19 : vector<4xf32> to vector<1x4xf32>
    %21 = vector.extract_strided_slice %1 {offsets = [0, 0, 0], sizes = [5, 16, 4], strides = [1, 1, 1]} : vector<16x16x4xf32> to vector<5x16x4xf32>
    %cst_10 = arith.constant dense<0xFF800000> : vector<16x4xf32>
    %22 = vector.multi_reduction <maximumf>, %21, %cst_10 [0] : vector<5x16x4xf32> to vector<16x4xf32>
    %23 = vector.extract_strided_slice %1 {offsets = [5, 0, 0], sizes = [6, 16, 4], strides = [1, 1, 1]} : vector<16x16x4xf32> to vector<6x16x4xf32>
    %cst_11 = arith.constant dense<0xFF800000> : vector<16x4xf32>
    %24 = vector.multi_reduction <maximumf>, %23, %cst_11 [0] : vector<6x16x4xf32> to vector<16x4xf32>
    %25 = vector.extract_strided_slice %1 {offsets = [11, 0, 0], sizes = [5, 16, 4], strides = [1, 1, 1]} : vector<16x16x4xf32> to vector<5x16x4xf32>
    %cst_12 = arith.constant dense<0xFF800000> : vector<16x4xf32>
    %26 = vector.multi_reduction <maximumf>, %25, %cst_12 [0] : vector<5x16x4xf32> to vector<16x4xf32>
    %27 = vector.extract_strided_slice %22 {offsets = [0, 0], sizes = [5, 4], strides = [1, 1]} : vector<16x4xf32> to vector<5x4xf32>
    %cst_13 = arith.constant dense<0xFF800000> : vector<4xf32>
    %28 = vector.multi_reduction <maximumf>, %27, %cst_13 [0] : vector<5x4xf32> to vector<4xf32>
    %29 = vector.shape_cast %28 : vector<4xf32> to vector<1x4xf32>
    %30 = vector.extract_strided_slice %24 {offsets = [0, 0], sizes = [5, 4], strides = [1, 1]} : vector<16x4xf32> to vector<5x4xf32>
    %cst_14 = arith.constant dense<0xFF800000> : vector<4xf32>
    %31 = vector.multi_reduction <maximumf>, %30, %cst_14 [0] : vector<5x4xf32> to vector<4xf32>
    %32 = vector.shape_cast %31 : vector<4xf32> to vector<1x4xf32>
    %33 = vector.extract_strided_slice %26 {offsets = [0, 0], sizes = [5, 4], strides = [1, 1]} : vector<16x4xf32> to vector<5x4xf32>
    %cst_15 = arith.constant dense<0xFF800000> : vector<4xf32>
    %34 = vector.multi_reduction <maximumf>, %33, %cst_15 [0] : vector<5x4xf32> to vector<4xf32>
    %35 = vector.shape_cast %34 : vector<4xf32> to vector<1x4xf32>
    %36 = vector.extract_strided_slice %22 {offsets = [5, 0], sizes = [6, 4], strides = [1, 1]} : vector<16x4xf32> to vector<6x4xf32>
    %cst_16 = arith.constant dense<0xFF800000> : vector<4xf32>
    %37 = vector.multi_reduction <maximumf>, %36, %cst_16 [0] : vector<6x4xf32> to vector<4xf32>
    %38 = vector.shape_cast %37 : vector<4xf32> to vector<1x4xf32>
    %39 = vector.extract_strided_slice %24 {offsets = [5, 0], sizes = [6, 4], strides = [1, 1]} : vector<16x4xf32> to vector<6x4xf32>
    %cst_17 = arith.constant dense<0xFF800000> : vector<4xf32>
    %40 = vector.multi_reduction <maximumf>, %39, %cst_17 [0] : vector<6x4xf32> to vector<4xf32>
    %41 = vector.shape_cast %40 : vector<4xf32> to vector<1x4xf32>
    %42 = vector.extract_strided_slice %26 {offsets = [5, 0], sizes = [6, 4], strides = [1, 1]} : vector<16x4xf32> to vector<6x4xf32>
    %cst_18 = arith.constant dense<0xFF800000> : vector<4xf32>
    %43 = vector.multi_reduction <maximumf>, %42, %cst_18 [0] : vector<6x4xf32> to vector<4xf32>
    %44 = vector.shape_cast %43 : vector<4xf32> to vector<1x4xf32>
    %45 = vector.extract_strided_slice %22 {offsets = [11, 0], sizes = [5, 4], strides = [1, 1]} : vector<16x4xf32> to vector<5x4xf32>
    %cst_19 = arith.constant dense<0xFF800000> : vector<4xf32>
    %46 = vector.multi_reduction <maximumf>, %45, %cst_19 [0] : vector<5x4xf32> to vector<4xf32>
    %47 = vector.shape_cast %46 : vector<4xf32> to vector<1x4xf32>
    %48 = vector.extract_strided_slice %24 {offsets = [11, 0], sizes = [5, 4], strides = [1, 1]} : vector<16x4xf32> to vector<5x4xf32>
    %cst_20 = arith.constant dense<0xFF800000> : vector<4xf32>
    %49 = vector.multi_reduction <maximumf>, %48, %cst_20 [0] : vector<5x4xf32> to vector<4xf32>
    %50 = vector.shape_cast %49 : vector<4xf32> to vector<1x4xf32>
    %51 = vector.extract_strided_slice %26 {offsets = [11, 0], sizes = [5, 4], strides = [1, 1]} : vector<16x4xf32> to vector<5x4xf32>
    %cst_21 = arith.constant dense<0xFF800000> : vector<4xf32>
    %52 = vector.multi_reduction <maximumf>, %51, %cst_21 [0] : vector<5x4xf32> to vector<4xf32>
    %53 = vector.shape_cast %52 : vector<4xf32> to vector<1x4xf32>
    %54 = tpu.concatenate %4, %11, %14, %17, %20, %29, %32, %35, %38, %41, %44, %47, %50, %53 in 0 : vector<1x4xf32>, vector<1x4xf32>, vector<1x4xf32>, vector<1x4xf32>, vector<1x4xf32>, vector<1x4xf32>, vector<1x4xf32>, vector<1x4xf32>, vector<1x4xf32>, vector<1x4xf32>, vector<1x4xf32>, vector<1x4xf32>, vector<1x4xf32>, vector<1x4xf32> -> vector<14x4xf32>
    %c0_22 = arith.constant 0 : index
    %c0_23 = arith.constant 0 : index
    %c0_24 = arith.constant 0 : index
    %55 = vector.load %arg3[%c0_22, %c0_23, %c0_24] : memref<1x14x4xf32, #tpu.memory_space<vmem>>, vector<1x14x4xf32>
    %56 = vector.shape_cast %55 : vector<1x14x4xf32> to vector<14x4xf32>
    %57 = vector.shape_cast %54 : vector<14x4xf32> to vector<1x14x4xf32>
    tpu.vector_store %arg3[%c0_22, %c0_23, %c0_24], %57 {strides = array<i32>} : memref<1x14x4xf32, #tpu.memory_space<vmem>>, vector<1x14x4xf32>,
    return
  }
  func.func @transform_0(%arg0: i32, %arg1: i32) -> (i32, i32, i32, i32) {
    %c0_i32 = arith.constant 0 : i32
    %c0_i32_0 = arith.constant 0 : i32
    %c0_i32_1 = arith.constant 0 : i32
    return %arg0, %c0_i32, %c0_i32_0, %arg1 : i32, i32, i32, i32
  }
  func.func @transform_1(%arg0: i32, %arg1: i32) -> (i32, i32, i32) {
    %c0_i32 = arith.constant 0 : i32
    %c0_i32_0 = arith.constant 0 : i32
    return %arg0, %c0_i32, %arg1 : i32, i32, i32
  }
}

</mosaic_0001>

<bundles_post_ra>
// kernel: tpu_custom_call.1
= control target key start
LH: loop header
LB: loop body
LE: loop exit
PB: predicated region body
PF: predicated region fallthrough
CT: control target
= control target key end

     0   :  { %s565_s6 = smov 0   ;;  %s567_s7 = smov 0   ;;  %s831_s0 = inlined_call_operand.vmem [shape: f32[2,16,16,4], index: 0, kind: input, shape index: {}]   ;;  %s832_s1 = inlined_call_operand.vmem [shape: f32[2,14,4], index: 1, kind: output, shape index: {}]  }
   0x1   :  { %s569_s8 = smov 0  }
   0x2 LB: > { %s23_s9 = sadd.s32 1, %s549_s7  ;;  %p498_p0 = scmp.ge.s32.totalorder %s553_s8, 1  ;;  %s553_s8 = sphi %s569_s8, %s11_s8   ;;  %s549_s7 = sphi %s567_s7, %s834_s7   ;;  %s545_s6 = sphi %s565_s6, %s833_s6  }
   0x3   : > { %p25_p1 = scmp.ge.s32.totalorder %s23_s9, 2  ;;  %p106_p2 = scmp.lt.s32.totalorder %s553_s8, 3 }
   0x5   : > { %s836_s9 = smov (%p25_p1, %s23_s9), 0  ;;  %p107_p3 = pnand %p498_p0, %p106_p2 }
   0x6   : > { %p132_p4 = scmp.lt.s32.totalorder (!%p107_p3), %s545_s6, 1 }
   0x7   : > { %110 = sbr.rel (%p107_p3) target bundleno = 76 (0x4c), region = 24 }
   0xc   : > { %s838_s6 = smov (!%p132_p4, %s545_s6), 1  ;;  %vm180_vm0 = vcmask 31744   ;;  %vm316_vm1 = vcmask 28672   ;;  %vm338_vm2 = vcmask 31749   ;;  %vm340_vm3 = vcmask 26624  }
   0xd   : > { %s505_s10 = sshll.u32 %s838_s6, 8  ;;  %vm367_vm4 = vcmask 31747   ;;  %vm389_vm5 = vcmask 1040384   ;;  %vm391_vm6 = vcmask 1041408   ;;  %vm393_vm7 = vcmask 1042432   ;;  %s506_s14 = sshll.u32 %s838_s6, 4 }
   0xe   : > { %s589_s13 = scalar_lea.vmem %s831_s0, %s505_s10  ;;  %vm395_vm8 = vcmask 1043456   ;;  %vm397_vm9 = vcmask 1044480   ;;  %vm399_vm10 = vcmask 1045504   ;;  %vm401_vm11 = vcmask 1046528   ;;  %s147_s17 = scalar_lea.vmem %s832_s1, %s506_s14 }
   0xf   : > { %v148_v0 = vld [vmem:[%s589_s13] sm:$0xff]  ;;  %v149_v1 = vld [vmem:[%s589_s13 + $0x8] sm:$0xff]  ;;  %v150_v2 = vld [vmem:[%s589_s13 + $0x10] sm:$0xff]  ;;  %vm409_vm12 = vcmask 29696  }
  0x10   : > { %v151_v3 = vld [vmem:[%s589_s13 + $0x18] sm:$0xff]  ;;  %v152_v4 = vld [vmem:[%s589_s13 + $0x20] sm:$0xff]  ;;  %v153_v5 = vld [vmem:[%s589_s13 + $0x28] sm:$0xff]  ;;  %v181_v6 = vsel %vm180_vm0, %v148_v0, -inf  ;;  %v182_v7 = vsel %vm180_vm0, %v150_v2, -inf  ;;  %v212_v8 = vsel %vm180_vm0, %v149_v1, -inf }
  0x11   : > { %v154_v9 = vld [vmem:[%s589_s13 + $0x30] sm:$0xff]  ;;  %v155_v10 = vld [vmem:[%s589_s13 + $0x38] sm:$0xff]  ;;  %v156_v11 = vld [vmem:[%s589_s13 + $0x40] sm:$0xff]  ;;  %v183_v12 = vsel %vm180_vm0, %v152_v4, -inf  ;;  %v213_v13 = vsel %vm180_vm0, %v151_v3, -inf  ;;  %v214_v14 = vsel %vm180_vm0, %v153_v5, -inf }
  0x12   : > { %v157_v15 = vld [vmem:[%s589_s13 + $0x48] sm:$0xff]  ;;  %v158_v16 = vld [vmem:[%s589_s13 + $0x50] sm:$0xff]  ;;  %v159_v17 = vld [vmem:[%s589_s13 + $0x58] sm:$0xff]  ;;  %v184_v18 = vmax.f32 %v181_v6, %v183_v12  ;;  %v185_v19 = vsel %vm180_vm0, %v154_v9, -inf  ;;  %v187_v20 = vsel %vm180_vm0, %v156_v11, -inf  ;;  %v215_v21 = vmax.f32 %v212_v8, %v214_v14 }
  0x13   : > { %v160_v22 = vld [vmem:[%s589_s13 + $0x60] sm:$0xff]  ;;  %v162_v23 = vld [vmem:[%s589_s13 + $0x70] sm:$0xff]  ;;  %v613_v24 = vmax.f32 %v182_v7, %v185_v19  ;;  %v616_v25 = vsel %vm180_vm0, %v158_v16, -inf  ;;  %v216_v26 = vsel %vm180_vm0, %v155_v10, -inf  ;;  %v218_v27 = vsel %vm180_vm0, %v157_v15, -inf  ;;  %v161_v28 = vld [vmem:[%s589_s13 + $0x68] sm:$0xff] }
  0x14   : > { %v163_v29 = vld [vmem:[%s589_s13 + $0x78] sm:$0xff]  ;;  %v164_v30 = vld [vmem:[%s589_s13 + $0x80] sm:$0xff]  ;;  %v623_v31 = vmax.f32 %v184_v18, %v187_v20  ;;  %v626_v32 = vsel %vm180_vm0, %v160_v22, -inf  ;;  %v629_v33 = vsel %vm180_vm0, %v162_v23, -inf  ;;  %v631_v34 = vmax.f32 %v213_v13, %v216_v26  ;;  %v166_v35 = vld [vmem:[%s589_s13 + $0x90] sm:$0xff] }
  0x15   : > { %v168_v36 = vld [vmem:[%s589_s13 + $0xa0] sm:$0xff]  ;;  %v190_v37 = vmax.f32 %v613_v24, %v616_v25  ;;  %v638_v38 = vsel %vm180_vm0, %v164_v30, -inf  ;;  %v640_v39 = vmax.f32 %v215_v21, %v218_v27  ;;  %v643_v40 = vsel %vm180_vm0, %v159_v17, -inf  ;;  %v165_v41 = vld [vmem:[%s589_s13 + $0x88] sm:$0xff]  ;;  %v170_v42 = vld [vmem:[%s589_s13 + $0xb0] sm:$0xff] }
  0x16   : > { %v192_v43 = vmax.f32 %v623_v31, %v626_v32  ;;  %v650_v44 = vsel %vm180_vm0, %v166_v35, -inf  ;;  %v653_v45 = vsel %vm180_vm0, %v168_v36, -inf  ;;  %v221_v46 = vmax.f32 %v631_v34, %v643_v40  ;;  %v167_v47 = vld [vmem:[%s589_s13 + $0x98] sm:$0xff]  ;;  %v172_v48 = vld [vmem:[%s589_s13 + $0xc0] sm:$0xff]  ;;  %v174_v49 = vld [vmem:[%s589_s13 + $0xd0] sm:$0xff] }
  0x17   : > { %v194_v50 = vmax.f32 %v190_v37, %v629_v33  ;;  %v662_v51 = vsel %vm180_vm0, %v170_v42, -inf  ;;  %v665_v52 = vsel %vm180_vm0, %v161_v28, -inf  ;;  %v668_v53 = vsel %vm180_vm0, %v163_v29, -inf  ;;  %v169_v54 = vld [vmem:[%s589_s13 + $0xa8] sm:$0xff]  ;;  %v171_v55 = vld [vmem:[%s589_s13 + $0xb8] sm:$0xff]  ;;  %v176_v56 = vld [vmem:[%s589_s13 + $0xe0] sm:$0xff] }
  0x18   : > { %v196_v57 = vmax.f32 %v192_v43, %v638_v38  ;;  %v675_v58 = vsel %vm180_vm0, %v172_v48, -inf  ;;  %v678_v59 = vsel %vm180_vm0, %v174_v49, -inf  ;;  %v223_v60 = vmax.f32 %v640_v39, %v665_v52  ;;  %v173_v61 = vld [vmem:[%s589_s13 + $0xc8] sm:$0xff]  ;;  %v175_v62 = vld [vmem:[%s589_s13 + $0xd8] sm:$0xff]  ;;  %v178_v63 = vld [vmem:[%s589_s13 + $0xf0] sm:$0xff] }
  0x19   : > { %v198_v0 = vmax.f32 %v194_v50, %v650_v44  ;;  %v687_v1 = vsel %vm180_vm0, %v176_v56, -inf  ;;  %v225_v2 = vmax.f32 %v221_v46, %v668_v53  ;;  %v691_v3 = vsel %vm180_vm0, %v165_v41, -inf  ;;  %v177_v4 = vld [vmem:[%s589_s13 + $0xe8] sm:$0xff]  ;;  %v179_v5 = vld [vmem:[%s589_s13 + $0xf8] sm:$0xff] }
  0x1a   : > { %v200_v6 = vmax.f32 %v196_v57, %v653_v45  ;;  %v697_v7 = vsel %vm180_vm0, %v178_v63, -inf  ;;  %v227_v8 = vmax.f32 %v223_v60, %v691_v3  ;;  %v701_v9 = vsel %vm180_vm0, %v167_v47, -inf }
  0x1b   : > { %v202_v10 = vmax.f32 %v198_v0, %v662_v51  ;;  %v229_v11 = vmax.f32 %v225_v2, %v701_v9  ;;  %v706_v12 = vsel %vm180_vm0, %v169_v54, -inf  ;;  %v709_v13 = vsel %vm180_vm0, %v171_v55, -inf }
  0x1c   : > { %v204_v14 = vmax.f32 %v200_v6, %v675_v58  ;;  %v231_v15 = vmax.f32 %v227_v8, %v706_v12  ;;  %v714_v16 = vsel %vm180_vm0, %v173_v61, -inf  ;;  %v717_v17 = vsel %vm180_vm0, %v175_v62, -inf }
  0x1d   : > { %v206_v18 = vmax.f32 %v202_v10, %v678_v59  ;;  %v233_v19 = vmax.f32 %v229_v11, %v709_v13  ;;  %v722_v20 = vsel %vm180_vm0, %v177_v4, -inf  ;;  %v725_v21 = vsel %vm180_vm0, %v179_v5, -inf }
  0x1e   : > { %v208_v22 = vmax.f32 %v204_v14, %v687_v1  ;;  %v235_v23 = vmax.f32 %v231_v15, %v714_v16  ;;  %v252_v26 = vmax.f32 %v192_v43, %v194_v50  ;;  %v253_v27 = vmax.f32 %v223_v60, %v225_v2 }
  0x1f   : > { %v210_v28 = vmax.f32 %v206_v18, %v697_v7  ;;  %v237_v29 = vmax.f32 %v233_v19, %v717_v17  ;;  %v254_v30 = vmax.f32 %v638_v38, %v653_v45  ;;  %v255_v35 = vmax.f32 %v650_v44, %v662_v51 }
  0x20   : > { %v239_v36 = vmax.f32 %v235_v23, %v722_v20  ;;  %v261_v37 = vmax.f32 %v691_v3, %v706_v12  ;;  %v262_v41 = vmax.f32 %v701_v9, %v709_v13  ;;  %v268_v42 = vsel %vm180_vm0, %v252_v26, -inf }
  0x21   : > { %v211_v43 = vmax.f32 %v208_v22, %v210_v28  ;;  %v241_v46 = vmax.f32 %v237_v29, %v725_v21  ;;  %v256_v47 = vmax.f32 %v254_v30, %v675_v58  ;;  %v257_v48 = vmax.f32 %v255_v35, %v678_v59 }
  0x22   : > { %v263_v49 = vmax.f32 %v261_v37, %v714_v16  ;;  %v264_v50 = vmax.f32 %v262_v41, %v717_v17  ;;  %v269_v54 = vrot.slane %v268_v42, 4  ;;  %v282_v55 = vsel %vm180_vm0, %v253_v27, -inf }
  0x23   : > { %v242_v56 = vmax.f32 %v239_v36, %v241_v46  ;;  %v243_v57 = vsel %vm180_vm0, %v211_v43, -inf  ;;  %v258_v60 = vmax.f32 %v256_v47, %v687_v1  ;;  %v259_v61 = vmax.f32 %v257_v48, %v697_v7 }
  0x24   : > { %v265_v62 = vmax.f32 %v263_v49, %v722_v20  ;;  %v266_v63 = vmax.f32 %v264_v50, %v725_v21  ;;  %v270_v0 = vmax.f32 %v268_v42, %v269_v54  ;;  %v283_v2 = vrot.slane %v282_v55, 4 }
  0x25   : > { %v244_v4 = vsel %vm180_vm0, %v242_v56, -inf  ;;  %v260_v5 = vmax.f32 %v258_v60, %v259_v61  ;;  %v296_v6 = vmax.f32 %v623_v31, %v613_v24  ;;  %v757_v8 = vmax.f32 %v640_v39, %v631_v34 }
  0x26   : > { %v245_v10 = vmax.f32 %v243_v57, %v244_v4  ;;  %v267_v11 = vmax.f32 %v265_v62, %v266_v63  ;;  %v271_v14 = vrot.slane %v270_v0, 2  ;;  %v284_v15 = vmax.f32 %v282_v55, %v283_v2 }
  0x27   : > { %v275_v18 = vsel %vm180_vm0, %v260_v5, -inf  ;;  %v298_v19 = vmax.f32 %v616_v25, %v629_v33  ;;  %v299_v22 = vmax.f32 %v626_v32, %v638_v38  ;;  %v303_v24 = vmax.f32 %v643_v40, %v668_v53 }
  0x28   : > { %v246_v31 = vrot.slane %v245_v10, 4  ;;  %v272_v23 = vmax.f32 %v270_v0, %v271_v14  ;;  %v276_v34 = vrot.slane %v275_v18, 4  ;;  %v285_v39 = vrot.slane %v284_v15, 2 }
  0x29   : > { %v289_v26 = vsel %vm180_vm0, %v267_v11, -inf  ;;  %v300_v27 = vmax.f32 %v298_v19, %v650_v44  ;;  %v301_v28 = vmax.f32 %v299_v22, %v653_v45  ;;  %v304_v25 = vmax.f32 %v665_v52, %v691_v3 }
  0x2a   : > { %v247_v33 = vmax.f32 %v245_v10, %v246_v31  ;;  %v273_v29 = vrot.slane %v272_v23, 1  ;;  %v277_v32 = vmax.f32 %v275_v18, %v276_v34  ;;  %v286_v38 = vmax.f32 %v284_v15, %v285_v39 }
  0x2b   : > { %v290_v30 = vrot.slane %v289_v26, 4  ;;  %v302_v40 = vmax.f32 %v300_v27, %v301_v28  ;;  %v305_v53 = vmax.f32 %v303_v24, %v701_v9  ;;  %v306_v35 = vmax.f32 %v304_v25, %v706_v12 }
  0x2c   : > { %v248_v36 = vrot.slane %v247_v33, 2  ;;  %v773_v37 = vmax.f32 %v272_v23, %v273_v29  ;;  %v278_v41 = vrot.slane %v277_v32, 2  ;;  %v287_v44 = vrot.slane %v286_v38, 1 }
  0x2d   : > { %v291_v45 = vmax.f32 %v289_v26, %v290_v30  ;;  %v307_v42 = vmax.f32 %v305_v53, %v306_v35  ;;  %v308_v52 = vmax.f32 %v662_v51, %v678_v59  ;;  %v309_v3 = vmax.f32 %v675_v58, %v687_v1 }
  0x2e   : > { %v249_v43 = vmax.f32 %v247_v33, %v248_v36  ;;  %v279_v46 = vmax.f32 %v277_v32, %v278_v41  ;;  %v779_v47 = vmax.f32 %v286_v38, %v287_v44  ;;  %v312_v9 = vmax.f32 %v709_v13, %v717_v17 }
  0x2f   : > { %v292_v12 = vrot.slane %v291_v45, 2  ;;  %v310_v48 = vmax.f32 %v308_v52, %v697_v7  ;;  %v313_v49 = vmax.f32 %v714_v16, %v722_v20  ;;  %v317_v50 = vsel %vm316_vm1, %v296_v6, -inf }
  0x30   : > { %v250_v54 = vrot.slane %v249_v43, 1  ;;  %v280_v51 = vrot.slane %v279_v46, 1  ;;  %v314_v59 = vmax.f32 %v312_v9, %v725_v21  ;;  %v318_v58 = vrot.slane %v317_v50, 4 }
  0x31   : > { %v293_v1 = vmax.f32 %v291_v45, %v292_v12  ;;  %v311_v55 = vmax.f32 %v310_v48, %v309_v3  ;;  %v324_v56 = vsel %vm316_vm1, %v302_v40, -inf  ;;  %v339_v57 = vsel %vm338_vm2, %v296_v6, -inf }
  0x32   : > { %v251_v13 = vmax.f32 %v249_v43, %v250_v54  ;;  %v790_v17 = vmax.f32 %v279_v46, %v280_v51  ;;  %v315_v7 = vmax.f32 %v314_v59, %v313_v49  ;;  %v319_v60 = vmax.f32 %v317_v50, %v318_v58 }
  0x33   : > { %v294_v61 = vrot.slane %v293_v1, 1  ;;  %v325_v16 = vrot.slane %v324_v56, 4  ;;  %v331_v20 = vsel %vm316_vm1, %v311_v55, -inf  ;;  %v341_v62 = vsel %vm340_vm3, %v757_v8, -inf }
  0x34   : > { %v320_v21 = vrot.slane %v319_v60, 2  ;;  %v332_v63 = vrot.slane %v331_v20, 4  ;;  %v342_v0 = vmax.f32 %v339_v57, %v341_v62  ;;  %v349_v2 = vsel %vm338_vm2, %v302_v40, -inf }
  0x35   : > { %v295_v4 = vmax.f32 %v293_v1, %v294_v61  ;;  %v326_v5 = vmax.f32 %v324_v56, %v325_v16  ;;  %v350_v6 = vsel %vm340_vm3, %v307_v42, -inf  ;;  %v358_v10 = vsel %vm338_vm2, %v311_v55, -inf }
  0x36   : > { %v321_v11 = vmax.f32 %v319_v60, %v320_v21  ;;  %v333_v14 = vmax.f32 %v331_v20, %v332_v63  ;;  %v343_v15 = vrot.slane %v342_v0, 4  ;;  %v351_v18 = vmax.f32 %v349_v2, %v350_v6 }
  0x37   : > { %v327_v19 = vrot.slane %v326_v5, 2  ;;  %v359_v22 = vsel %vm340_vm3, %v315_v7, -inf  ;;  %v368_v24 = vsel %vm367_vm4, %v757_v8, -inf  ;;  %v375_v31 = vsel %vm367_vm4, %v307_v42, -inf }
  0x38   : > { %v322_v23 = vrot.slane %v321_v11, 1  ;;  %v334_v34 = vrot.slane %v333_v14, 2  ;;  %v344_v39 = vmax.f32 %v342_v0, %v343_v15  ;;  %v352_v26 = vrot.slane %v351_v18, 4 }
  0x39   : > { %v328_v27 = vmax.f32 %v326_v5, %v327_v19  ;;  %v360_v28 = vmax.f32 %v358_v10, %v359_v22  ;;  %v369_v25 = vrot.slane %v368_v24, 4  ;;  %v376_v33 = vrot.slane %v375_v31, 4 }
  0x3a   : > { %v323_v29 = vmax.f32 %v321_v11, %v322_v23  ;;  %v335_v32 = vmax.f32 %v333_v14, %v334_v34  ;;  %v345_v38 = vrot.slane %v344_v39, 2  ;;  %v353_v30 = vmax.f32 %v351_v18, %v352_v26 }
  0x3b   : > { %v329_v40 = vrot.slane %v328_v27, 1  ;;  %v361_v53 = vrot.slane %v360_v28, 4  ;;  %v370_v8 = vmax.f32 %v368_v24, %v369_v25  ;;  %v377_v35 = vmax.f32 %v375_v31, %v376_v33 }
  0x3c   : > { %v336_v36 = vrot.slane %v335_v32, 1  ;;  %v346_v41 = vmax.f32 %v344_v39, %v345_v38  ;;  %v354_v44 = vrot.slane %v353_v30, 2  ;;  %v382_v45 = vsel %vm367_vm4, %v315_v7, -inf }
  0x3d   : > { %v330_v42 = vmax.f32 %v328_v27, %v329_v40  ;;  %v362_v52 = vmax.f32 %v360_v28, %v361_v53  ;;  %v371_v3 = vrot.slane %v370_v8, 2  ;;  %v378_v43 = vrot.slane %v377_v35, 2 }
  0x3e   : > { %v337_v46 = vmax.f32 %v335_v32, %v336_v36  ;;  %v347_v9 = vrot.slane %v346_v41, 1  ;;  %v355_v12 = vmax.f32 %v353_v30, %v354_v44  ;;  %v383_v48 = vrot.slane %v382_v45, 4 }
  0x3f   : > { %v363_v49 = vrot.slane %v362_v52, 2  ;;  %v372_v50 = vmax.f32 %v370_v8, %v371_v3  ;;  %v379_v54 = vmax.f32 %v377_v35, %v378_v43  ;;  %v390_v51 = vsel %vm389_vm5, %v251_v13, %v773_v37 }
  0x40   : > { %v348_v59 = vmax.f32 %v346_v41, %v347_v9  ;;  %v356_v58 = vrot.slane %v355_v12, 1  ;;  %v384_v1 = vmax.f32 %v382_v45, %v383_v48  ;;  %v392_v55 = vsel %vm391_vm6, %v390_v51, %v790_v17 }
  0x41   : > { %v364_v56 = vmax.f32 %v362_v52, %v363_v49  ;;  %v373_v57 = vrot.slane %v372_v50, 1  ;;  %v380_v7 = vrot.slane %v379_v54, 1  ;;  %v394_v60 = vsel %vm393_vm7, %v392_v55, %v779_v47 }
  0x42   : > { %v357_v61 = vmax.f32 %v355_v12, %v356_v58  ;;  %v385_v16 = vrot.slane %v384_v1, 2  ;;  %v396_v20 = vsel %vm395_vm8, %v394_v60, %v295_v4 }
  0x43   : > { %v365_v37 = vrot.slane %v364_v56, 1  ;;  %v398_v13 = vsel %vm397_vm9, %v396_v20, %v323_v29  ;;  %v374_v62 = vmax.f32 %v372_v50, %v373_v57  ;;  %v381_v47 = vmax.f32 %v379_v54, %v380_v7 }
  0x44   : > { %v386_v17 = vmax.f32 %v384_v1, %v385_v16  ;;  %v400_v21 = vsel %vm399_vm10, %v398_v13, %v330_v42  ;;  %v403_v63 = vsel %vm389_vm5, %v348_v59, %v357_v61 }
  0x45   : > { %v366_v0 = vmax.f32 %v364_v56, %v365_v37  ;;  %v402_v2 = vsel %vm401_vm11, %v400_v21, %v337_v46 }
  0x46   : > { %v387_v5 = vrot.slane %v386_v17, 1  ;;  %408 = vst.msk [vmem:[%s147_s17] sm:$0xff] %vm180_vm0, %v402_v2 }
  0x47   : > { %v404_v4 = vsel %vm391_vm6, %v403_v63, %v366_v0 }
  0x48   : > { %v388_v6 = vmax.f32 %v386_v17, %v387_v5  ;;  %v405_v10 = vsel %vm393_vm7, %v404_v4, %v374_v62 }
  0x49   : > { %v406_v11 = vsel %vm395_vm8, %v405_v10, %v381_v47 }
  0x4a   : > { %v407_v14 = vsel %vm397_vm9, %v406_v11, %v388_v6 }
  0x4b   : > { %410 = vst.msk [vmem:[%s147_s17 + $0x8] sm:$0x3f] %vm409_vm12, %v407_v14 }
  0x4c PF: > { %s11_s8 = sadd.s32 1, %s553_s8   ;;  %s833_s6 = smov %s549_s7 }
  0x4d   : > { %p8_p5 = scmp.ge.s32.totalorder %s11_s8, 4   ;;  %s834_s7 = smov %s836_s9 }
  0x4f   :  { %10 = sbr.rel (!%p8_p5) target bundleno = 2 (0x2), region = 54 }

</bundles_post_ra>
